<compile_context>
chip_gen: v5e
topology: v5e:2x2
jax: 0.10.0
libtpu: 0.0.40
codegen_flags: <defaults>
</compile_context>

<pallas_src>
import functools
import math

import jax
import jax.numpy as jnp
from jax.experimental import pallas as pl
from jax.experimental.pallas import tpu as pltpu


def _cdiv(a, b):
    return -(-a // b)


def _round_up(n, m):
    return ((n + m - 1) // m) * m


def _mlp_kernel(x_ref, w1_ref, b1_ref, w2_ref, b2_ref, w3_ref, b3_ref,
                w4_ref, b4_ref, out_ref, h2_ref, *, relu_out):
    """One batch tile of the fused 4-layer MLP (hidden layers feature-major)."""
    dt = w1_ref.dtype                                   # matmul dtype (f32/bf16)

    # (tb, in) -> (in, tb): batch becomes the dense lane axis (XLU transpose).
    x_fm = x_ref[...].astype(dt).T

    # Hidden layers: weights (out, in), biases (out, 1); f32 accumulation,
    # bias + ReLU on fully dense (features, tb) vregs.
    h1 = jnp.dot(w1_ref[...], x_fm, preferred_element_type=jnp.float32)
    h1 = jnp.maximum(h1 + b1_ref[...].astype(jnp.float32), 0.0)        # (h1, tb)
    # TODO(synk): dropout (ratio > 0, training mode) elided -- identity here.
    h2 = jnp.dot(w2_ref[...], h1.astype(dt), preferred_element_type=jnp.float32)
    h2 = jnp.maximum(h2 + b2_ref[...].astype(jnp.float32), 0.0)        # (h2, tb)

    h3 = jnp.dot(w3_ref[...], h2.astype(dt), preferred_element_type=jnp.float32)
    h3 = jnp.maximum(h3 + b3_ref[...].astype(jnp.float32), 0.0)        # (h3, tb)

    # Output layer back in batch-major (w4 is (h3, out), b4 is (1, out)) so both
    # results are stored in the module's (batch, feature) layout.
    h3_bm = h3.astype(dt).T                                            # (tb, h3)
    out = jnp.dot(h3_bm, w4_ref[...], preferred_element_type=jnp.float32)
    out = out + b4_ref[...].astype(jnp.float32)
    if relu_out:
        out = jnp.maximum(out, 0.0)

    out_ref[...] = out.astype(out_ref.dtype)                           # (tb, out)
    h2_ref[...] = h2.T.astype(h2_ref.dtype)                            # (tb, h2)


def _pick_batch_tile(batch, max_tile):
    """Return (batch_tile, grid_steps)."""
    if batch <= max_tile:
        # Single grid step; block spans the whole batch (legal for any size,
        # no pipeline/step overhead at all).
        return batch, 1
    n = _cdiv(batch, max_tile)
    if n % 2:          # prefer an even step count -> balanced v7x megacore split
        n += 1
    tb = _round_up(_cdiv(batch, n), 128)   # 128-aligned: batch is the lane axis
    return tb, _cdiv(batch, tb)            # of the feature-major internals


def objective_estimator_forward(x, params, *, relu_out=False, batch_tile=None,
                                max_batch_tile=2048):
    """Pallas forward pass. Returns (output, hidden2) like the PyTorch module."""
    w1, b1, w2, b2, w3, b3, w4, b4 = params
    B, in_sz = x.shape
    h1_sz, h2_sz, h3_sz = w1.shape[0], w2.shape[0], w3.shape[0]
    out_sz = w4.shape[1]
    assert w1.shape == (h1_sz, in_sz) and w2.shape == (h2_sz, h1_sz)
    assert w3.shape == (h3_sz, h2_sz) and w4.shape == (h3_sz, out_sz)
    pdt = w1.dtype
    assert all(p.dtype == pdt for p in params), "all params must share one dtype"

    if batch_tile is None:
        tb, grid = _pick_batch_tile(B, max_batch_tile)
    else:
        tb = min(batch_tile, B)
        assert tb == B or tb % 8 == 0, "batch_tile must be a multiple of 8"
        grid = _cdiv(B, tb)

    def _full(shape):
        # Full-array block with a constant block index: fetched once, kept
        # resident in VMEM across all grid steps.
        return pl.BlockSpec(shape, lambda i: (0, 0))

    kernel = functools.partial(_mlp_kernel, relu_out=relu_out)

    itemsize = jnp.dtype(x.dtype).itemsize
    n_param_elems = sum(int(p.size) for p in params)
    cost = pl.CostEstimate(
        flops=2 * B * (in_sz * h1_sz + h1_sz * h2_sz + h2_sz * h3_sz
                       + h3_sz * out_sz),
        transcendentals=0,
        bytes_accessed=B * (in_sz + out_sz + h2_sz) * itemsize
                       + n_param_elems * jnp.dtype(pdt).itemsize,
    )

    out, hidden2 = pl.pallas_call(
        kernel,
        out_shape=(
            jax.ShapeDtypeStruct((B, out_sz), x.dtype),
            jax.ShapeDtypeStruct((B, h2_sz), x.dtype),
        ),
        grid_spec=pltpu.PrefetchScalarGridSpec(
            num_scalar_prefetch=0,
            grid=(grid,),
            in_specs=[
                pl.BlockSpec((tb, in_sz), lambda i: (i, 0)),   # x (batch tiled)
                _full((h1_sz, in_sz)), _full((h1_sz, 1)),      # layer 1
                _full((h2_sz, h1_sz)), _full((h2_sz, 1)),      # layer 2
                _full((h3_sz, h2_sz)), _full((h3_sz, 1)),      # layer 3
                _full((h3_sz, out_sz)), _full((1, out_sz)),    # output layer
            ],
            out_specs=[
                pl.BlockSpec((tb, out_sz), lambda i: (i, 0)),
                pl.BlockSpec((tb, h2_sz), lambda i: (i, 0)),
            ],
        ),
        compiler_params=pltpu.CompilerParams(
            dimension_semantics=("parallel",),
            vmem_limit_bytes=32 * 1024 * 1024,
        ),
        cost_estimate=cost,
    )(x, w1, b1, w2, b2, w3, b3, w4, b4)

    return out, hidden2


def init_params(key, input_size, hidden_sizes, output_size, dtype=jnp.float32):
    """PyTorch-Linear-style init: U(-1/sqrt(fan_in), 1/sqrt(fan_in)).

    Kernel layout: hidden layers keep PyTorch's (out, in) weight layout with
    (out, 1) biases (feature-major compute); the output layer is stored
    transposed as (in, out) with a (1, out) bias (batch-major compute).
    """
    dims = [input_size] + list(hidden_sizes) + [output_size]
    n_layers = len(dims) - 1
    params = []
    for li, (fan_in, fan_out) in enumerate(zip(dims[:-1], dims[1:])):
        key, kw, kb = jax.random.split(key, 3)
        bound = 1.0 / math.sqrt(fan_in)
        if li < n_layers - 1:
            w = jax.random.uniform(kw, (fan_out, fan_in), dtype, -bound, bound)
            b = jax.random.uniform(kb, (fan_out, 1), dtype, -bound, bound)
        else:
            w = jax.random.uniform(kw, (fan_in, fan_out), dtype, -bound, bound)
            b = jax.random.uniform(kb, (1, fan_out), dtype, -bound, bound)
        params.extend([w, b])
    return tuple(params)


def reference_forward(x, params, relu_out=False):
    w1, b1, w2, b2, w3, b3, w4, b4 = params
    h1 = jnp.maximum(x @ w1.T + b1.T, 0.0)
    h2 = jnp.maximum(h1 @ w2.T + b2.T, 0.0)
    h3 = jnp.maximum(h2 @ w3.T + b3.T, 0.0)
    out = h3 @ w4 + b4
    if relu_out:
        out = jnp.maximum(out, 0.0)
    return out, h2


if __name__ == "__main__":
    key = jax.random.PRNGKey(0)
    k_params, k_x, k_x2 = jax.random.split(key, 3)

    # Small shapes consistent with the module's __init__ signature.
    batch = 8
    input_size = 16
    hidden_sizes = (32, 32, 32)
    output_size = 4

    params = init_params(k_params, input_size, hidden_sizes, output_size)
    x = jax.random.normal(k_x, (batch, input_size), dtype=jnp.float32)

    # Test 1: tiny batch -> single grid step (block == full batch).
    out, hidden2 = objective_estimator_forward(x, params, relu_out=False)
    jax.block_until_ready((out, hidden2))
    ref_out, ref_h2 = reference_forward(x, params, relu_out=False)
    assert out.shape == (batch, output_size)
    assert hidden2.shape == (batch, hidden_sizes[1])
    assert jnp.allclose(out, ref_out, atol=1e-5, rtol=1e-5)
    assert jnp.allclose(hidden2, ref_h2, atol=1e-5, rtol=1e-5)

    # Test 2: multi-step grid with a ragged last block (no wrapper pad / output
    # slice) and the relu_out=True variant.
    batch2 = 200
    x2 = jax.random.normal(k_x2, (batch2, input_size), dtype=jnp.float32)
    out2, h2_2 = objective_estimator_forward(x2, params, relu_out=True,
                                             batch_tile=128)
    jax.block_until_ready((out2, h2_2))
    ref_out2, ref_h2_2 = reference_forward(x2, params, relu_out=True)
    assert out2.shape == (batch2, output_size)
    assert h2_2.shape == (batch2, hidden_sizes[1])
    assert jnp.allclose(out2, ref_out2, atol=1e-5, rtol=1e-5)
    assert jnp.allclose(h2_2, ref_h2_2, atol=1e-5, rtol=1e-5)

    print("KERNEL_OK")
</pallas_src>

<mosaic_0001>
module attributes {stable_mosaic.version = 11 : i64} {
  func.func @_mlp_kernel(%arg0: i32, %arg1: memref<8x16xf32, #tpu.memory_space<vmem>>, %arg2: memref<32x16xf32, #tpu.memory_space<vmem>>, %arg3: memref<32x1xf32, #tpu.memory_space<vmem>>, %arg4: memref<32x32xf32, #tpu.memory_space<vmem>>, %arg5: memref<32x1xf32, #tpu.memory_space<vmem>>, %arg6: memref<32x32xf32, #tpu.memory_space<vmem>>, %arg7: memref<32x1xf32, #tpu.memory_space<vmem>>, %arg8: memref<32x4xf32, #tpu.memory_space<vmem>>, %arg9: memref<1x4xf32, #tpu.memory_space<vmem>>, %arg10: memref<8x4xf32, #tpu.memory_space<vmem>>, %arg11: memref<8x32xf32, #tpu.memory_space<vmem>>) attributes {dimension_semantics = [#tpu.dimension_semantics<parallel>], iteration_bounds = array<i64: 1>, scalar_prefetch = 0 : i64, scratch_operands = 0 : i64, tpu.core_type = #tpu.core_type<tc>, window_params = [{transform_indices = @transform_0, window_bounds = array<i64: 8, 16>}, {pipeline_mode = #tpu.pipeline_mode<synchronous>, transform_indices = @transform_1, window_bounds = array<i64: 32, 16>}, {pipeline_mode = #tpu.pipeline_mode<synchronous>, transform_indices = @transform_2, window_bounds = array<i64: 32, 1>}, {pipeline_mode = #tpu.pipeline_mode<synchronous>, transform_indices = @transform_3, window_bounds = array<i64: 32, 32>}, {pipeline_mode = #tpu.pipeline_mode<synchronous>, transform_indices = @transform_4, window_bounds = array<i64: 32, 1>}, {pipeline_mode = #tpu.pipeline_mode<synchronous>, transform_indices = @transform_5, window_bounds = array<i64: 32, 32>}, {pipeline_mode = #tpu.pipeline_mode<synchronous>, transform_indices = @transform_6, window_bounds = array<i64: 32, 1>}, {pipeline_mode = #tpu.pipeline_mode<synchronous>, transform_indices = @transform_7, window_bounds = array<i64: 32, 4>}, {pipeline_mode = #tpu.pipeline_mode<synchronous>, transform_indices = @transform_8, window_bounds = array<i64: 1, 4>}, {transform_indices = @transform_9, window_bounds = array<i64: 8, 4>}, {transform_indices = @transform_10, window_bounds = array<i64: 8, 32>}]} {
    %c0 = arith.constant 0 : index
    %c0_0 = arith.constant 0 : index
    %0 = vector.load %arg1[%c0, %c0_0] : memref<8x16xf32, #tpu.memory_space<vmem>>, vector<8x16xf32>
    %1 = tpu.transpose %0, [1, 0] : vector<8x16xf32> -> vector<16x8xf32>
    %c0_1 = arith.constant 0 : index
    %c0_2 = arith.constant 0 : index
    %2 = vector.load %arg2[%c0_1, %c0_2] : memref<32x16xf32, #tpu.memory_space<vmem>>, vector<32x16xf32>
    %cst = arith.constant dense<0.000000e+00> : vector<32x8xf32>
    %3 = tpu.matmul %2, %1, %cst {dimension_numbers = #tpu.dot_dimension_numbers<[1], [0], [0], [1], [0, 0, 1, 1], [], []>} : vector<32x16xf32>, vector<16x8xf32>, vector<32x8xf32> -> vector<32x8xf32>
    %c0_3 = arith.constant 0 : index
    %c0_4 = arith.constant 0 : index
    %4 = vector.load %arg3[%c0_3, %c0_4] : memref<32x1xf32, #tpu.memory_space<vmem>>, vector<32x1xf32>
    %5 = vector.broadcast %4 : vector<32x1xf32> to vector<32x8xf32>
    %6 = arith.addf %3, %5 : vector<32x8xf32>
    %cst_5 = arith.constant 0.000000e+00 : f32
    %7 = vector.broadcast %cst_5 : f32 to vector<32x8xf32>
    %8 = arith.maximumf %6, %7 : vector<32x8xf32>
    %c0_6 = arith.constant 0 : index
    %c0_7 = arith.constant 0 : index
    %9 = vector.load %arg4[%c0_6, %c0_7] : memref<32x32xf32, #tpu.memory_space<vmem>>, vector<32x32xf32>
    %cst_8 = arith.constant dense<0.000000e+00> : vector<32x8xf32>
    %10 = tpu.matmul %9, %8, %cst_8 {dimension_numbers = #tpu.dot_dimension_numbers<[1], [0], [0], [1], [0, 0, 1, 1], [], []>} : vector<32x32xf32>, vector<32x8xf32>, vector<32x8xf32> -> vector<32x8xf32>
    %c0_9 = arith.constant 0 : index
    %c0_10 = arith.constant 0 : index
    %11 = vector.load %arg5[%c0_9, %c0_10] : memref<32x1xf32, #tpu.memory_space<vmem>>, vector<32x1xf32>
    %12 = vector.broadcast %11 : vector<32x1xf32> to vector<32x8xf32>
    %13 = arith.addf %10, %12 : vector<32x8xf32>
    %cst_11 = arith.constant 0.000000e+00 : f32
    %14 = vector.broadcast %cst_11 : f32 to vector<32x8xf32>
    %15 = arith.maximumf %13, %14 : vector<32x8xf32>
    %c0_12 = arith.constant 0 : index
    %c0_13 = arith.constant 0 : index
    %16 = vector.load %arg6[%c0_12, %c0_13] : memref<32x32xf32, #tpu.memory_space<vmem>>, vector<32x32xf32>
    %cst_14 = arith.constant dense<0.000000e+00> : vector<32x8xf32>
    %17 = tpu.matmul %16, %15, %cst_14 {dimension_numbers = #tpu.dot_dimension_numbers<[1], [0], [0], [1], [0, 0, 1, 1], [], []>} : vector<32x32xf32>, vector<32x8xf32>, vector<32x8xf32> -> vector<32x8xf32>
    %c0_15 = arith.constant 0 : index
    %c0_16 = arith.constant 0 : index
    %18 = vector.load %arg7[%c0_15, %c0_16] : memref<32x1xf32, #tpu.memory_space<vmem>>, vector<32x1xf32>
    %19 = vector.broadcast %18 : vector<32x1xf32> to vector<32x8xf32>
    %20 = arith.addf %17, %19 : vector<32x8xf32>
    %cst_17 = arith.constant 0.000000e+00 : f32
    %21 = vector.broadcast %cst_17 : f32 to vector<32x8xf32>
    %22 = arith.maximumf %20, %21 : vector<32x8xf32>
    %23 = tpu.transpose %22, [1, 0] : vector<32x8xf32> -> vector<8x32xf32>
    %c0_18 = arith.constant 0 : index
    %c0_19 = arith.constant 0 : index
    %24 = vector.load %arg8[%c0_18, %c0_19] : memref<32x4xf32, #tpu.memory_space<vmem>>, vector<32x4xf32>
    %cst_20 = arith.constant dense<0.000000e+00> : vector<8x4xf32>
    %25 = tpu.matmul %23, %24, %cst_20 {dimension_numbers = #tpu.dot_dimension_numbers<[1], [0], [0], [1], [0, 0, 1, 1], [], []>} : vector<8x32xf32>, vector<32x4xf32>, vector<8x4xf32> -> vector<8x4xf32>
    %c0_21 = arith.constant 0 : index
    %c0_22 = arith.constant 0 : index
    %26 = vector.load %arg9[%c0_21, %c0_22] : memref<1x4xf32, #tpu.memory_space<vmem>>, vector<1x4xf32>
    %27 = vector.broadcast %26 : vector<1x4xf32> to vector<8x4xf32>
    %28 = arith.addf %25, %27 : vector<8x4xf32>
    %c0_23 = arith.constant 0 : index
    %c0_24 = arith.constant 0 : index
    %29 = vector.load %arg10[%c0_23, %c0_24] : memref<8x4xf32, #tpu.memory_space<vmem>>, vector<8x4xf32>
    tpu.vector_store %arg10[%c0_23, %c0_24], %28 {strides = array<i32>} : memref<8x4xf32, #tpu.memory_space<vmem>>, vector<8x4xf32>,
    %30 = tpu.transpose %15, [1, 0] : vector<32x8xf32> -> vector<8x32xf32>
    %c0_25 = arith.constant 0 : index
    %c0_26 = arith.constant 0 : index
    %31 = vector.load %arg11[%c0_25, %c0_26] : memref<8x32xf32, #tpu.memory_space<vmem>>, vector<8x32xf32>
    tpu.vector_store %arg11[%c0_25, %c0_26], %30 {strides = array<i32>} : memref<8x32xf32, #tpu.memory_space<vmem>>, vector<8x32xf32>,
    return
  }
  func.func @transform_0(%arg0: i32) -> (i32, i32) {
    %c0_i32 = arith.constant 0 : i32
    %c0_i32_0 = arith.constant 0 : i32
    return %arg0, %c0_i32 : i32, i32
  }
  func.func @transform_1(%arg0: i32) -> (i32, i32) {
    %c0_i32 = arith.constant 0 : i32
    %c0_i32_0 = arith.constant 0 : i32
    %c0_i32_1 = arith.constant 0 : i32
    return %c0_i32, %c0_i32_0 : i32, i32
  }
  func.func @transform_2(%arg0: i32) -> (i32, i32) {
    %c0_i32 = arith.constant 0 : i32
    %c0_i32_0 = arith.constant 0 : i32
    %c0_i32_1 = arith.constant 0 : i32
    return %c0_i32, %c0_i32_0 : i32, i32
  }
  func.func @transform_3(%arg0: i32) -> (i32, i32) {
    %c0_i32 = arith.constant 0 : i32
    %c0_i32_0 = arith.constant 0 : i32
    %c0_i32_1 = arith.constant 0 : i32
    return %c0_i32, %c0_i32_0 : i32, i32
  }
  func.func @transform_4(%arg0: i32) -> (i32, i32) {
    %c0_i32 = arith.constant 0 : i32
    %c0_i32_0 = arith.constant 0 : i32
    %c0_i32_1 = arith.constant 0 : i32
    return %c0_i32, %c0_i32_0 : i32, i32
  }
  func.func @transform_5(%arg0: i32) -> (i32, i32) {
    %c0_i32 = arith.constant 0 : i32
    %c0_i32_0 = arith.constant 0 : i32
    %c0_i32_1 = arith.constant 0 : i32
    return %c0_i32, %c0_i32_0 : i32, i32
  }
  func.func @transform_6(%arg0: i32) -> (i32, i32) {
    %c0_i32 = arith.constant 0 : i32
    %c0_i32_0 = arith.constant 0 : i32
    %c0_i32_1 = arith.constant 0 : i32
    return %c0_i32, %c0_i32_0 : i32, i32
  }
  func.func @transform_7(%arg0: i32) -> (i32, i32) {
    %c0_i32 = arith.constant 0 : i32
    %c0_i32_0 = arith.constant 0 : i32
    %c0_i32_1 = arith.constant 0 : i32
    return %c0_i32, %c0_i32_0 : i32, i32
  }
  func.func @transform_8(%arg0: i32) -> (i32, i32) {
    %c0_i32 = arith.constant 0 : i32
    %c0_i32_0 = arith.constant 0 : i32
    %c0_i32_1 = arith.constant 0 : i32
    return %c0_i32, %c0_i32_0 : i32, i32
  }
  func.func @transform_9(%arg0: i32) -> (i32, i32) {
    %c0_i32 = arith.constant 0 : i32
    %c0_i32_0 = arith.constant 0 : i32
    return %arg0, %c0_i32 : i32, i32
  }
  func.func @transform_10(%arg0: i32) -> (i32, i32) {
    %c0_i32 = arith.constant 0 : i32
    %c0_i32_0 = arith.constant 0 : i32
    return %arg0, %c0_i32 : i32, i32
  }
}

</mosaic_0001>

<bundles_post_ra>
// kernel: tpu_custom_call.1
= control target key start
LH: loop header
LB: loop body
LE: loop exit
PB: predicated region body
PF: predicated region fallthrough
CT: control target
= control target key end

     0   :  { %vm64_vm0 = vcmask 130048   ;;  %v425_v3 = vmov 0   ;;  %s593_s0 = inlined_call_operand.vmem [shape: f32[8,16], index: 0, kind: input, shape index: {}]   ;;  %s594_s1 = inlined_call_operand.vmem [shape: f32[32,16], index: 1, kind: input, shape index: {}]   ;;  %s595_s2 = inlined_call_operand.vmem [shape: f32[32,1], index: 2, kind: input, shape index: {}]   ;;  %s596_s3 = inlined_call_operand.vmem [shape: f32[32,32], index: 3, kind: input, shape index: {}]   ;;  %s597_s4 = inlined_call_operand.vmem [shape: f32[32,1], index: 4, kind: input, shape index: {}]   ;;  %s598_s5 = inlined_call_operand.vmem [shape: f32[32,32], index: 5, kind: input, shape index: {}]   ;;  %s599_s6 = inlined_call_operand.vmem [shape: f32[32,1], index: 6, kind: input, shape index: {}]   ;;  %s600_s7 = inlined_call_operand.vmem [shape: f32[32,4], index: 7, kind: input, shape index: {}]   ;;  %s601_s8 = inlined_call_operand.vmem [shape: f32[1,4], index: 8, kind: input, shape index: {}]   ;;  %s602_s9 = inlined_call_operand.vmem [shape: f32[8,4], index: 9, kind: output, shape index: {0}]   ;;  %s603_s10 = inlined_call_operand.hbm [shape: f32[8,32], index: 10, kind: output, shape index: {1}]  }
   0x1   :  { %v35_v0 = vld [vmem:[%s593_s0] sm:$0xff]  ;;  %v41_v1 = vld [vmem:[%s595_s2 + $0x8] sm:$0xff]  ;;  %396 = vset.pattern.permute.xlu1 %v425_v3  ;;  %v43_v4 = vld [vmem:[%s595_s2 + $0x18] sm:$0xff]  ;;  %395 = vset.pattern.permute.xlu0 %v425_v3 }
   0x2   :  { %378 = vmatpush.xpose.msk.msra.mxu0 %vm64_vm0, %v35_v0  ;;  %v36_v2 = vld [vmem:[%s594_s1] sm:$0xff]  ;;  %51 = vperm.xlu1 %396, %v41_v1  }
   0x3   :  { %61 = vperm.xlu0 %395, %v43_v4   ;;  %397 = vset.pattern.permute.xlu2 %v425_v3 }
   0x5   :  { %379 = vmatmul.msk.f32.vlgmr.msra.gmra.mxu0 %vm64_vm0, %v36_v2 }
   0x6   :  { %16 = vsyncpa [#allocation3], 0  ;;  %v40_v5 = vld [vmem:[%s595_s2] sm:$0xff]  ;;  %v42_v6 = vld [vmem:[%s595_s2 + $0x10] sm:$0xff]  ;;  %vm141_vm1 = vcmask 261120   ;;  %s367_s23 = sshll.u32 %s603_s10, 4  ;;  %s368_s23 = int_to_ptr.hbm [resolvable:$true] %s367_s23 }
   0x7   :  { %v37_v7 = vld [vmem:[%s594_s1 + $0x8] sm:$0xff]  ;;  %v117_v8 = vld [vmem:[%s597_s4] sm:$0xff]  ;;  %v38_v10 = vld [vmem:[%s594_s1 + $0x10] sm:$0xff]  ;;  %vm323_vm2 = vcmask 31744  }
   0x8   :  { %v118_v9 = vld [vmem:[%s597_s4 + $0x8] sm:$0xff]  ;;  %v193_v11 = vld [vmem:[%s599_s6 + $0x10] sm:$0xff]  ;;  %v39_v13 = vld [vmem:[%s594_s1 + $0x18] sm:$0xff] }
   0x9   :  { %v192_v12 = vld [vmem:[%s599_s6 + $0x8] sm:$0xff]  ;;  %v120_v26 = vld [vmem:[%s597_s4 + $0x18] sm:$0xff]  ;;  %v113_v31 = vld [vmem:[%s596_s3] sm:$0xff] }
   0xa   :  { %46 = vperm.xlu1 %396, %v40_v5   ;;  %138 = vperm.xlu2 %397, %v120_v26   ;;  %v119_v32 = vld [vmem:[%s597_s4 + $0x10] sm:$0xff]  ;;  %v114_v33 = vld [vmem:[%s596_s3 + $0x8] sm:$0xff]  ;;  %v191_v34 = vld [vmem:[%s599_s6] sm:$0xff] }
   0xb   :  { %56 = vperm.xlu0 %395, %v42_v6   ;;  %v115_v35 = vld [vmem:[%s596_s3 + $0x10] sm:$0xff]  ;;  %v194_v36 = vld [vmem:[%s599_s6 + $0x18] sm:$0xff]  ;;  %v187_v54 = vld [vmem:[%s598_s5] sm:$0xff] }
   0xc   :  { %v116_v37 = vld [vmem:[%s596_s3 + $0x18] sm:$0xff]  ;;  %v188_v55 = vld [vmem:[%s598_s5 + $0x8] sm:$0xff]  ;;  %v189_v56 = vld [vmem:[%s598_s5 + $0x10] sm:$0xff] }
   0xd   :  { %380 = vmatmul.msk.f32.gmra.mxu0 %vm64_vm0, %v37_v7  ;;  %v190_v57 = vld [vmem:[%s598_s5 + $0x18] sm:$0xff]  ;;  %v294_v59 = vld [vmem:[%s600_s7 + $0x10] sm:$0xff]  ;;  %v293_v60 = vld [vmem:[%s600_s7 + $0x8] sm:$0xff] }
   0xe   :  { %v295_v58 = vld [vmem:[%s600_s7 + $0x18] sm:$0xff]  ;;  %v292_v0 = vld [vmem:[%s600_s7] sm:$0xff]  ;;  %s426_s7 = smov [#allocation2]  }
   0xf   :  { %315 = vmatpush.msra.mxu3 %v295_v58  ;;  %s365_s0 = sshll.u32 %s426_s7, 4  ;;  %s366_s0 = int_to_ptr.vmem [resolvable:$true] %s365_s0 }
  0x11   :  { %316 = vmatpush.msra.mxu3 %v294_v59 }
  0x12   :  { %123 = vperm.xlu1 %396, %v117_v8   ;;  %133 = vperm.xlu2 %397, %v119_v32  }
  0x13   :  { %128 = vperm.xlu0 %395, %v118_v9   ;;  %317 = vmatpush.msra.mxu3 %v293_v60 }
  0x15   :  { %381 = vmatmul.msk.f32.gmra.mxu0 %vm64_vm0, %v38_v10  ;;  %318 = vmatpush.msra.mxu3 %v292_v0 }
  0x1a   :  { %207 = vperm.xlu1 %396, %v193_v11   ;;  %197 = vperm.xlu2 %397, %v191_v34  }
  0x1b   :  { %202 = vperm.xlu0 %395, %v192_v12  }
  0x1d   :  { %382 = vmatmul.msk.f32.gmra.mxu0 %vm64_vm0, %v39_v13 }
  0x22   :  { %212 = vperm.xlu2 %397, %v194_v36  }
  0x64   :  { %v139_v42 = vpop.permute.xlu2 %138 }
  0x6c   :  { %v134_v47 = vpop.permute.xlu2 %133 }
  0x74   :  { %v52_v17 = vpop.permute.xlu1 %51  ;;  %v198_v61 = vpop.permute.xlu2 %197 }
  0x75   :  { %v62_v16 = vpop.permute.xlu0 %61 }
  0x7c   :  { %v47_v23 = vpop.permute.xlu1 %46  ;;  %v213_v10 = vpop.permute.xlu2 %212 }
  0x7d   :  { %v57_v19 = vpop.permute.xlu0 %56 }
  0x82   :  { %v97_v14 = vpop.f32.mrf.mxu0 }
  0x83   :  { %v98_v27 = vadd.f32 %v97_v14, %v47_v23 }
  0x84   :  { %v124_v38 = vpop.permute.xlu1 %123 }
  0x85   :  { %v109_v30 = vmax.f32 %v98_v27, 0.0  ;;  %v129_v43 = vpop.permute.xlu0 %128 }
  0x8a   :  { %v100_v15 = vpop.f32.mrf.mxu0 }
  0x8b   :  { %v101_v24 = vadd.f32 %v100_v15, %v52_v17 }
  0x8c   :  { %v208_v6 = vpop.permute.xlu1 %207 }
  0x8d   :  { %v110_v29 = vmax.f32 %v101_v24, 0.0  ;;  %v203_v2 = vpop.permute.xlu0 %202 }
  0x92   :  { %v103_v18 = vpop.f32.mrf.mxu0 }
  0x93   :  { %v104_v21 = vadd.f32 %v103_v18, %v57_v19 }
  0x95   :  { %v111_v28 = vmax.f32 %v104_v21, 0.0 }
  0x9a   :  { %v106_v20 = vpop.f32.mrf.mxu0 }
  0x9b   :  { %v107_v22 = vadd.f32 %v106_v20, %v62_v16  ;;  %v398_v16 = vld [vmem:[%s601_s8] ss:$0 sm:$0xff] }
  0x9d   :  { %v112_v25 = vmax.f32 %v107_v22, 0.0 }
  0x9f   :  { %166 = vmatpush.msra.mxu1 %v112_v25 }
  0xa1   :  { %167 = vmatpush.msra.mxu1 %v111_v28 }
  0xa3   :  { %168 = vmatpush.msra.mxu1 %v110_v29 }
  0xa5   :  { %169 = vmatpush.msra.mxu1 %v109_v30 }
  0xa6   :  { %383 = vmatmul.msk.f32.vlgmr.msra.gmra.mxu1 %vm141_vm1, %v113_v31 }
  0xae   :  { %384 = vmatmul.msk.f32.gmra.mxu1 %vm141_vm1, %v114_v33 }
  0xb6   :  { %385 = vmatmul.msk.f32.gmra.mxu1 %vm141_vm1, %v115_v35 }
  0xbe   :  { %386 = vmatmul.msk.f32.gmra.mxu1 %vm141_vm1, %v116_v37 }
 0x123   :  { %v171_v39 = vpop.f32.mrf.mxu1 }
 0x124   :  { %v172_v40 = vadd.f32 %v171_v39, %v124_v38 }
 0x126   :  { %v183_v41 = vmax.f32 %v172_v40, 0.0 }
 0x128   :  { %325 = vxpose.xlu1.b32.start [1/4] (short) (narrow) %v183_v41, 8 }
 0x12b   :  { %v174_v44 = vpop.f32.mrf.mxu1 }
 0x12c   :  { %v175_v45 = vadd.f32 %v174_v44, %v129_v43 }
 0x12e   :  { %v184_v46 = vmax.f32 %v175_v45, 0.0 }
 0x130   :  { %326 = vxpose.xlu1.b32.cont [2/4] (short) (narrow) %v184_v46, 8 }
 0x133   :  { %v177_v48 = vpop.f32.mrf.mxu1 }
 0x134   :  { %v178_v49 = vadd.f32 %v177_v48, %v134_v47 }
 0x136   :  { %v185_v50 = vmax.f32 %v178_v49, 0.0 }
 0x138   :  { %327 = vxpose.xlu1.b32.cont [3/4] (short) (narrow) %v185_v50, 8 }
 0x13b   :  { %v180_v51 = vpop.f32.mrf.mxu1 }
 0x13c   :  { %v181_v52 = vadd.f32 %v180_v51, %v139_v42 }
 0x13e   :  { %v186_v53 = vmax.f32 %v181_v52, 0.0 }
 0x140   :  { %239 = vmatpush.msra.mxu2 %v186_v53  ;;  %328 = vxpose.xlu1.b32.end [4/4] (short) (narrow) %v186_v53, 8 }
 0x142   :  { %240 = vmatpush.msra.mxu2 %v185_v50 }
 0x144   :  { %241 = vmatpush.msra.mxu2 %v184_v46 }
 0x146   :  { %242 = vmatpush.msra.mxu2 %v183_v41 }
 0x147   :  { %387 = vmatmul.msk.f32.vlgmr.msra.gmra.mxu2 %vm141_vm1, %v187_v54 }
 0x14f   :  { %388 = vmatmul.msk.f32.gmra.mxu2 %vm141_vm1, %v188_v55 }
 0x157   :  { %389 = vmatmul.msk.f32.gmra.mxu2 %vm141_vm1, %v189_v56 }
 0x15f   :  { %390 = vmatmul.msk.f32.gmra.mxu2 %vm141_vm1, %v190_v57 }
 0x1ca   :  { %v244_v62 = vpop.f32.mrf.mxu2 }
 0x1cb   :  { %v245_v63 = vadd.f32 %v244_v62, %v198_v61 }
 0x1cc   :  { %v341_v15 = vpop.trf.xlu1 }
 0x1cd   :  { %v256_v1 = vmax.f32 %v245_v63, 0.0  ;;  %357 = vst.msk [vmem:[#allocation2] sm:$0xff] %vm141_vm1, %v341_v15 }
 0x1ce   :  { %370 = dma.vmem_to_hbm [thread:$0]  %s366_s0, 128, %s368_s23, [#allocation3]  }
 0x1cf   :  { %260 = vxpose.xlu0.b32.start [1/4] (short) (narrow) %v256_v1, 8 }
 0x1d2   :  { %v247_v3 = vpop.f32.mrf.mxu2 }
 0x1d3   :  { %v248_v4 = vadd.f32 %v247_v3, %v203_v2 }
 0x1d5   :  { %v257_v5 = vmax.f32 %v248_v4, 0.0 }
 0x1d7   :  { %261 = vxpose.xlu0.b32.cont [2/4] (short) (narrow) %v257_v5, 8 }
 0x1da   :  { %v250_v7 = vpop.f32.mrf.mxu2 }
 0x1db   :  { %v251_v8 = vadd.f32 %v250_v7, %v208_v6 }
 0x1dd   :  { %v258_v9 = vmax.f32 %v251_v8, 0.0 }
 0x1df   :  { %262 = vxpose.xlu0.b32.cont [3/4] (short) (narrow) %v258_v9, 8 }
 0x1e2   :  { %v253_v11 = vpop.f32.mrf.mxu2 }
 0x1e3   :  { %v254_v12 = vadd.f32 %v253_v11, %v213_v10 }
 0x1e5   :  { %v259_v13 = vmax.f32 %v254_v12, 0.0 }
 0x1e7   :  { %263 = vxpose.xlu0.b32.end [4/4] (short) (narrow) %v259_v13, 8 }
 0x273   :  { %v276_v14 = vpop.trf.xlu0 }
 0x274   :  { %391 = vmatmul.msk.f32.vlgmr.msra.gmra.mxu3 %vm141_vm1, %v276_v14 }
 0x2f7   :  { %v320_v17 = vpop.f32.mrf.mxu3 }
 0x2f8   :  { %v321_v18 = vadd.f32 %v398_v16, %v320_v17 }
 0x2fa   :  { %324 = vst.msk [vmem:[%s602_s9] sm:$0xff] %vm323_vm2, %v321_v18 }
 0x2fb   :  { %423 = dma.done.wait [#allocation3], 128  }
 0x2fc   :  { %424 = vsyncadd [#allocation3], 4294967168 }
 0x2fd   :  { %377 = vsyncpa [#allocation3], 1 }

</bundles_post_ra>
